<compile_context>
chip_gen: v7x
topology: tpu7x:2x2x1
jax: 0.10.0
libtpu: 0.0.40
codegen_flags: <defaults>
</compile_context>

<pallas_src>
import numpy as np
import jax
import jax.numpy as jnp
from jax import lax
from jax.experimental import pallas as pl
from jax.experimental.pallas import tpu as pltpu


def _round_up(x, m):
    return (x + m - 1) // m * m


def _vmem_limit_bytes():
    # Generous-but-safe scoped-VMEM limit: ~3/4 of physical, capped at 96 MiB.
    # (v5e/v6e have 128 MiB physical, v7x only 64 MiB; scoped defaults are 16/32 MiB.)
    try:
        cap = pltpu.get_tpu_info().vmem_capacity_bytes
        return int(min(cap * 3 // 4, 96 * 1024 * 1024))
    except Exception:
        return 32 * 1024 * 1024


# ----------------------------------------------------------------------------
# Tiled matmul + bias kernels (out = x @ w + b), f32 accumulation.
# Grid: (M/tm, N/tn, K/tk); K sequential ("arbitrary"), M/N tiles "parallel".
# ----------------------------------------------------------------------------
def _mm_bias_kernel_bf16out(x_ref, w_ref, b_ref, o_ref, acc_ref):
    # Non-f32 output: accumulate into an f32 scratch, cast at the last K step.
    @pl.when(pl.program_id(2) == 0)
    def _():
        acc_ref[...] = jnp.zeros_like(acc_ref)

    acc_ref[...] += jnp.dot(x_ref[...], w_ref[...],
                            preferred_element_type=jnp.float32)

    @pl.when(pl.program_id(2) == pl.num_programs(2) - 1)
    def _():
        o_ref[...] = (acc_ref[...] + b_ref[...]).astype(o_ref.dtype)


def _mm_bias_kernel_f32out(x_ref, w_ref, b_ref, o_ref):
    # f32 output: the output block is resident across K -> accumulate directly.
    @pl.when(pl.program_id(2) == 0)
    def _():
        o_ref[...] = jnp.zeros_like(o_ref)

    o_ref[...] += jnp.dot(x_ref[...], w_ref[...],
                          preferred_element_type=jnp.float32)

    @pl.when(pl.program_id(2) == pl.num_programs(2) - 1)
    def _():
        o_ref[...] += b_ref[...]


def _mm_bias_scale_kernel_f32out(x_ref, w_ref, b_ref, s_ref, o_ref):
    # Same as above, plus a per-row scale (0/1 mask) folded into the epilogue.
    @pl.when(pl.program_id(2) == 0)
    def _():
        o_ref[...] = jnp.zeros_like(o_ref)

    o_ref[...] += jnp.dot(x_ref[...], w_ref[...],
                          preferred_element_type=jnp.float32)

    @pl.when(pl.program_id(2) == pl.num_programs(2) - 1)
    def _():
        o_ref[...] = (o_ref[...] + b_ref[...]) * s_ref[...]


def matmul_bias(x, w, b, *, tm=256, tn=512, tk=512, out_dtype=jnp.float32,
                row_scale=None):
    """Tiled (M,K)@(K,N) + (1,N), optional per-row scale, zero-padded tiles."""
    M, K = x.shape
    K2, N = w.shape
    assert K == K2 and b.shape == (1, N)
    # sublane-dim tiles: multiples of 16 (safe for f32 and packed bf16);
    # lane-dim tiles: multiples of 128.
    tm = min(tm, _round_up(M, 16))
    tn = min(tn, _round_up(N, 128))
    tk = min(tk, _round_up(K, 128))
    Mp, Kp, Np = _round_up(M, tm), _round_up(K, tk), _round_up(N, tn)
    xp = jnp.pad(x, ((0, Mp - M), (0, Kp - K)))
    wp = jnp.pad(w, ((0, Kp - K), (0, Np - N)))
    bp = jnp.pad(b.astype(jnp.float32), ((0, 0), (0, Np - N)))

    in_specs = [
        pl.BlockSpec((tm, tk), lambda i, j, k: (i, k)),
        pl.BlockSpec((tk, tn), lambda i, j, k: (k, j)),
        pl.BlockSpec((1, tn), lambda i, j, k: (0, j)),
    ]
    args = [xp, wp, bp]

    if out_dtype == jnp.float32:
        scratch_shapes = []
        if row_scale is not None:
            sp = jnp.pad(row_scale.astype(jnp.float32), ((0, Mp - M), (0, 0)))
            in_specs.append(pl.BlockSpec((tm, 1), lambda i, j, k: (i, 0)))
            args.append(sp)
            kernel = _mm_bias_scale_kernel_f32out
        else:
            kernel = _mm_bias_kernel_f32out
    else:
        assert row_scale is None
        kernel = _mm_bias_kernel_bf16out
        scratch_shapes = [pltpu.VMEM((tm, tn), jnp.float32)]

    out = pl.pallas_call(
        kernel,
        out_shape=jax.ShapeDtypeStruct((Mp, Np), out_dtype),
        grid_spec=pltpu.PrefetchScalarGridSpec(
            num_scalar_prefetch=0,
            grid=(Mp // tm, Np // tn, Kp // tk),
            in_specs=in_specs,
            out_specs=pl.BlockSpec((tm, tn), lambda i, j, k: (i, j)),
            scratch_shapes=scratch_shapes,
        ),
        compiler_params=pltpu.CompilerParams(
            dimension_semantics=("parallel", "parallel", "arbitrary"),
            vmem_limit_bytes=_vmem_limit_bytes()),
    )(*args)
    return out[:M, :N]


# ----------------------------------------------------------------------------
# LSTM recurrence, gridded over (B-chunks [parallel], T-chunks [arbitrary]).
# gates_x (input projection) is precomputed; each step is (Bt,D)@(D,4D) on the
# MXU plus elementwise gate math; W_hh stays VMEM-resident (constant index_map);
# h/c carry lives in VMEM scratch, initialized at the first T-chunk.
# ----------------------------------------------------------------------------
def _lstm_recurrence_kernel(gx_ref, h0_ref, c0_ref, whh_ref, hs_ref, h_sc, c_sc):
    # gx_ref: (Tt, Bt, 4D) bf16   h0/c0: (Bt, D) f32   whh: (D, 4D) bf16
    # hs_ref: (Tt, Bt, D) bf16    h_sc/c_sc: (Bt, D) f32 carry across T-chunks.
    @pl.when(pl.program_id(1) == 0)
    def _():
        h_sc[...] = h0_ref[...]
        c_sc[...] = c0_ref[...]

    D = h0_ref.shape[-1]
    Tt = gx_ref.shape[0]
    whh = whh_ref[...]

    def step(t, carry):
        h, c = carry                                           # (Bt, D) f32 carries
        gates = gx_ref[t].astype(jnp.float32) + jnp.dot(
            h.astype(whh.dtype), whh, preferred_element_type=jnp.float32)
        # sigmoid(x) = 0.5*tanh(0.5*x) + 0.5 : one EUP op instead of exp+recip.
        # D is a multiple of 128 -> lane-aligned static slices (no XLU shuffles).
        i_g = 0.5 * jnp.tanh(0.5 * gates[:, 0 * D:1 * D]) + 0.5
        f_g = 0.5 * jnp.tanh(0.5 * gates[:, 1 * D:2 * D]) + 0.5
        g_g = jnp.tanh(gates[:, 2 * D:3 * D])
        o_g = 0.5 * jnp.tanh(0.5 * gates[:, 3 * D:4 * D]) + 0.5
        c_new = f_g * c + i_g * g_g
        h_new = o_g * jnp.tanh(c_new)
        hs_ref[t] = h_new.astype(hs_ref.dtype)
        return (h_new, c_new)

    h_fin, c_fin = lax.fori_loop(0, Tt, step, (h_sc[...], c_sc[...]), unroll=2)
    h_sc[...] = h_fin
    c_sc[...] = c_fin


def lstm_recurrence(gates_x, h0, c0, w_hh_bf16, *, bt, tt=16):
    T, B_pad, G = gates_x.shape
    D = G // 4
    assert B_pad % bt == 0
    tt = max(1, min(tt, T))
    T_pad = _round_up(T, tt)
    if T_pad != T:
        gates_x = jnp.pad(gates_x, ((0, T_pad - T), (0, 0), (0, 0)))

    hs = pl.pallas_call(
        _lstm_recurrence_kernel,
        out_shape=jax.ShapeDtypeStruct((T_pad, B_pad, D), jnp.bfloat16),
        grid_spec=pltpu.PrefetchScalarGridSpec(
            num_scalar_prefetch=0,
            grid=(B_pad // bt, T_pad // tt),
            in_specs=[
                pl.BlockSpec((tt, bt, G), lambda bi, ti: (ti, bi, 0)),  # gates_x
                pl.BlockSpec((bt, D), lambda bi, ti: (bi, 0)),          # h0
                pl.BlockSpec((bt, D), lambda bi, ti: (bi, 0)),          # c0
                pl.BlockSpec((D, G), lambda bi, ti: (0, 0)),            # W_hh (resident)
            ],
            out_specs=pl.BlockSpec((tt, bt, D), lambda bi, ti: (ti, bi, 0)),
            scratch_shapes=[pltpu.VMEM((bt, D), jnp.float32),
                            pltpu.VMEM((bt, D), jnp.float32)],
        ),
        compiler_params=pltpu.CompilerParams(
            dimension_semantics=("parallel", "arbitrary"),
            vmem_limit_bytes=_vmem_limit_bytes()),
    )(gates_x, h0, c0, w_hh_bf16)
    return hs[:T]


# ----------------------------------------------------------------------------
# Parameter construction (deterministic, mirrors Decoder.__init__/init_weights)
# ----------------------------------------------------------------------------
def make_params(key, embed_dim, decoder_dim, vocab_size, encoder_dim):
    ks = jax.random.split(key, 10)
    D, E, V, C = decoder_dim, embed_dim, vocab_size, encoder_dim
    k_lstm = 1.0 / np.sqrt(D)
    k_lin = 1.0 / np.sqrt(C)
    u = lambda k, shape, a: jax.random.uniform(k, shape, jnp.float32, -a, a)
    return dict(
        embedding=u(ks[0], (V, E), 0.1),                       # uniform_(-0.1, 0.1)
        # LSTMCell params, pre-transposed for x @ W style matmuls
        w_ih_t=u(ks[1], (E, 4 * D), k_lstm),
        w_hh_t=u(ks[2], (D, 4 * D), k_lstm),
        b_lstm=(u(ks[3], (1, 4 * D), k_lstm) + u(ks[4], (1, 4 * D), k_lstm)),
        # init_h / init_c Linear(encoder_dim, decoder_dim)
        w_init_h_t=u(ks[5], (C, D), k_lin),
        b_init_h=u(ks[6], (1, D), k_lin),
        w_init_c_t=u(ks[7], (C, D), k_lin),
        b_init_c=u(ks[8], (1, D), k_lin),
        # fc: weight uniform_(-0.1, 0.1), bias zero
        w_fc_t=u(ks[9], (D, V), 0.1),
        b_fc=jnp.zeros((1, V), jnp.float32),
        # f_beta / sigmoid exist in __init__ but are unused in forward().
    )


# ----------------------------------------------------------------------------
# Forward pass wrapper
# ----------------------------------------------------------------------------
def decoder_forward(params, encoder_out, encoded_captions, caption_lengths):
    B = encoder_out.shape[0]
    enc_dim = encoder_out.shape[-1]
    V, E = params["embedding"].shape
    D = params["w_hh_t"].shape[0]
    bf16 = jnp.bfloat16

    enc_flat = encoder_out.reshape(B, -1, enc_dim)             # (B, P, enc_dim)

    # ----- sort by caption length, descending (plain JAX glue) -----
    cap_len = caption_lengths.squeeze(1)
    sort_ind = jnp.argsort(-cap_len)
    cap_sorted = cap_len[sort_ind]
    enc_sorted = enc_flat[sort_ind]
    caps_sorted = encoded_captions[sort_ind]

    decode_lengths = cap_sorted - 1                            # (B,)
    # static loop bound, mirrors PyTorch's Python-int max(); forces one host sync
    max_dec = int(np.max(np.asarray(decode_lengths)))
    T = max_dec

    # ----- init hidden state: mean pool (XLA) + ONE merged (C, 2D) Pallas matmul
    mean_enc = jnp.mean(enc_sorted.astype(jnp.float32), axis=1)           # (B, C)
    w_init = jnp.concatenate([params["w_init_h_t"], params["w_init_c_t"]], axis=1)
    b_init = jnp.concatenate([params["b_init_h"], params["b_init_c"]], axis=1)
    hc0 = matmul_bias(mean_enc.astype(bf16), w_init.astype(bf16), b_init,
                      out_dtype=jnp.float32)                              # (B, 2D)
    h0, c0 = hc0[:, :D], hc0[:, D:]

    # ----- batch padding / chunking (bt = batch chunk of the recurrence grid) -----
    bt = 64 if B > 64 else _round_up(B, 8)
    B_pad = _round_up(B, bt)

    # ----- embeddings gathered directly in (T, B, E) order: transpose the tiny
    #       int32 index matrix instead of the (B, T, E) activations -----
    emb_t = params["embedding"][caps_sorted[:, :T].T]          # (T, B, E)
    if B_pad != B:
        emb_t = jnp.pad(emb_t, ((0, 0), (0, B_pad - B), (0, 0)))
        h0 = jnp.pad(h0, ((0, B_pad - B), (0, 0)))
        c0 = jnp.pad(c0, ((0, B_pad - B), (0, 0)))
    emb_flat = emb_t.reshape(T * B_pad, E).astype(bf16)

    # ----- hoisted input projection for ALL steps, emitted in bf16 -----
    gates_flat = matmul_bias(emb_flat, params["w_ih_t"].astype(bf16),
                             params["b_lstm"], out_dtype=bf16)  # (T*B_pad, 4D) bf16
    gates_x = gates_flat.reshape(T, B_pad, 4 * D)

    # ----- recurrence: grid over (B chunks [parallel], T chunks [arbitrary]) -----
    h_all = lstm_recurrence(gates_x, h0, c0, params["w_hh_t"].astype(bf16), bt=bt)
    # (T, B_pad, D) bf16

    # ----- fc projection over all (b, t) rows at once.  Transpose the D-width
    #       hidden states (not the V-width logits) so logits land as (B, T, V);
    #       the t >= decode_length mask is folded into the matmul epilogue. -----
    h_btd = jnp.transpose(h_all, (1, 0, 2)).reshape(B_pad * T, D)         # bf16
    mask_bt = (decode_lengths[:, None] > jnp.arange(T)[None, :]).astype(jnp.float32)
    if B_pad != B:
        mask_bt = jnp.pad(mask_bt, ((0, B_pad - B), (0, 0)))
    row_scale = mask_bt.reshape(B_pad * T, 1)

    logits = matmul_bias(h_btd, params["w_fc_t"].astype(bf16), params["b_fc"],
                         tm=1024, tn=512, out_dtype=jnp.float32,
                         row_scale=row_scale)                   # (B_pad*T, V) f32
    predictions = logits.reshape(B_pad, T, V)[:B]               # (B, T, V)

    return (predictions, caps_sorted,
            [int(x) for x in np.asarray(decode_lengths)], None, sort_ind)


# ----------------------------------------------------------------------------
# Pure-JAX reference mirroring the kernel's dtype flow (bf16 MXU operands,
# f32 accumulation, bf16-stored input-projection gates) for a sanity check.
# ----------------------------------------------------------------------------
def decoder_forward_ref(params, encoder_out, encoded_captions, caption_lengths):
    B = encoder_out.shape[0]
    enc_dim = encoder_out.shape[-1]
    V, E = params["embedding"].shape
    D = params["w_hh_t"].shape[0]
    bf16 = jnp.bfloat16

    enc_flat = encoder_out.reshape(B, -1, enc_dim)
    cap_len = caption_lengths.squeeze(1)
    sort_ind = jnp.argsort(-cap_len)
    cap_sorted = cap_len[sort_ind]
    enc_sorted = enc_flat[sort_ind]
    caps_sorted = encoded_captions[sort_ind]
    decode_lengths = cap_sorted - 1
    max_dec = int(np.max(np.asarray(decode_lengths)))

    mean_enc = jnp.mean(enc_sorted.astype(jnp.float32), axis=1).astype(bf16)
    h = (jnp.dot(mean_enc, params["w_init_h_t"].astype(bf16),
                 preferred_element_type=jnp.float32) + params["b_init_h"])
    c = (jnp.dot(mean_enc, params["w_init_c_t"].astype(bf16),
                 preferred_element_type=jnp.float32) + params["b_init_c"])

    emb = params["embedding"][caps_sorted][:, :max_dec, :].astype(bf16)
    w_ih = params["w_ih_t"].astype(bf16)
    w_hh = params["w_hh_t"].astype(bf16)
    w_fc = params["w_fc_t"].astype(bf16)

    preds = []
    for t in range(max_dec):
        gx = (jnp.dot(emb[:, t, :], w_ih, preferred_element_type=jnp.float32)
              + params["b_lstm"]).astype(bf16).astype(jnp.float32)
        gates = gx + jnp.dot(h.astype(bf16), w_hh, preferred_element_type=jnp.float32)
        i_g = jax.nn.sigmoid(gates[:, 0 * D:1 * D])
        f_g = jax.nn.sigmoid(gates[:, 1 * D:2 * D])
        g_g = jnp.tanh(gates[:, 2 * D:3 * D])
        o_g = jax.nn.sigmoid(gates[:, 3 * D:4 * D])
        c = f_g * c + i_g * g_g
        h = o_g * jnp.tanh(c)
        logit = (jnp.dot(h.astype(bf16), w_fc,
                         preferred_element_type=jnp.float32) + params["b_fc"])
        preds.append(logit)
    preds = jnp.stack(preds, axis=1)                            # (B, T, V)
    mask = (decode_lengths[:, None] > jnp.arange(max_dec)[None, :])[:, :, None]
    return jnp.where(mask, preds, 0.0)


# ----------------------------------------------------------------------------
if __name__ == "__main__":
    # small, deterministic shapes consistent with the module's forward()
    B = 4                 # batch
    enc_size = 2          # enc_image_size -> num_pixels = 4
    encoder_dim = 128
    embed_dim = 64
    decoder_dim = 128
    vocab_size = 256
    max_cap_len = 8

    key = jax.random.PRNGKey(0)
    k_p, k_enc, k_cap = jax.random.split(key, 3)

    params = make_params(k_p, embed_dim, decoder_dim, vocab_size, encoder_dim)

    encoder_out = jax.random.normal(
        k_enc, (B, enc_size, enc_size, encoder_dim), jnp.float32)
    encoded_captions = jax.random.randint(
        k_cap, (B, max_cap_len), 0, vocab_size, jnp.int32)
    caption_lengths = jnp.array([[5], [8], [6], [7]], dtype=jnp.int32)

    preds, caps_sorted, decode_lengths, alphas, sort_ind = decoder_forward(
        params, encoder_out, encoded_captions, caption_lengths)

    jax.block_until_ready(preds)
    jax.block_until_ready(caps_sorted)
    jax.block_until_ready(sort_ind)

    assert preds.shape == (B, max(decode_lengths), vocab_size)

    # numerical sanity check against the pure-JAX reference
    ref = decoder_forward_ref(params, encoder_out, encoded_captions, caption_lengths)
    np.testing.assert_allclose(np.asarray(preds), np.asarray(ref),
                               rtol=2e-2, atol=2e-2)

    print("KERNEL_OK")
</pallas_src>

<mosaic_0001>
module attributes {stable_mosaic.version = 11 : i64} {
  func.func @_mm_bias_kernel_f32out(%arg0: i32, %arg1: i32, %arg2: i32, %arg3: memref<16x128xbf16, #tpu.memory_space<vmem>>, %arg4: memref<128x256xbf16, #tpu.memory_space<vmem>>, %arg5: memref<1x256xf32, #tpu.memory_space<vmem>>, %arg6: memref<16x256xf32, #tpu.memory_space<vmem>>) attributes {dimension_semantics = [#tpu.dimension_semantics<parallel>, #tpu.dimension_semantics<parallel>, #tpu.dimension_semantics<arbitrary>], iteration_bounds = array<i64: 1, 1, 1>, scalar_prefetch = 0 : i64, scratch_operands = 0 : i64, tpu.core_type = #tpu.core_type<tc>, window_params = [{transform_indices = @transform_0, window_bounds = array<i64: 16, 128>}, {transform_indices = @transform_1, window_bounds = array<i64: 128, 256>}, {transform_indices = @transform_2, window_bounds = array<i64: 1, 256>}, {transform_indices = @transform_3, window_bounds = array<i64: 16, 256>}]} {
    %c0_i32 = arith.constant 0 : i32
    %0 = arith.cmpi eq, %arg2, %c0_i32 : i32
    %1 = arith.extui %0 : i1 to i32
    %c0_i32_0 = arith.constant 0 : i32
    %2 = arith.cmpi ne, %1, %c0_i32_0 : i32
    scf.if %2 {
      %cst_10 = arith.constant 0.000000e+00 : f32
      %12 = vector.broadcast %cst_10 : f32 to vector<16x256xf32>
      %c0_11 = arith.constant 0 : index
      %c0_12 = arith.constant 0 : index
      %13 = vector.load %arg6[%c0_11, %c0_12] : memref<16x256xf32, #tpu.memory_space<vmem>>, vector<16x256xf32>
      tpu.vector_store %arg6[%c0_11, %c0_12], %12 {strides = array<i32>} : memref<16x256xf32, #tpu.memory_space<vmem>>, vector<16x256xf32>,
    } else {
    }
    %c0 = arith.constant 0 : index
    %c0_1 = arith.constant 0 : index
    %3 = vector.load %arg6[%c0, %c0_1] : memref<16x256xf32, #tpu.memory_space<vmem>>, vector<16x256xf32>
    %c0_2 = arith.constant 0 : index
    %c0_3 = arith.constant 0 : index
    %4 = vector.load %arg3[%c0_2, %c0_3] : memref<16x128xbf16, #tpu.memory_space<vmem>>, vector<16x128xbf16>
    %c0_4 = arith.constant 0 : index
    %c0_5 = arith.constant 0 : index
    %5 = vector.load %arg4[%c0_4, %c0_5] : memref<128x256xbf16, #tpu.memory_space<vmem>>, vector<128x256xbf16>
    %cst = arith.constant dense<0.000000e+00> : vector<16x256xf32>
    %6 = tpu.matmul %4, %5, %cst {dimension_numbers = #tpu.dot_dimension_numbers<[1], [0], [0], [1], [0, 0, 1, 1], [], []>} : vector<16x128xbf16>, vector<128x256xbf16>, vector<16x256xf32> -> vector<16x256xf32>
    %7 = arith.addf %3, %6 : vector<16x256xf32>
    %c0_6 = arith.constant 0 : index
    %c0_7 = arith.constant 0 : index
    %8 = vector.load %arg6[%c0_6, %c0_7] : memref<16x256xf32, #tpu.memory_space<vmem>>, vector<16x256xf32>
    tpu.vector_store %arg6[%c0_6, %c0_7], %7 {strides = array<i32>} : memref<16x256xf32, #tpu.memory_space<vmem>>, vector<16x256xf32>,
    %c0_i32_8 = arith.constant 0 : i32
    %9 = arith.cmpi eq, %arg2, %c0_i32_8 : i32
    %10 = arith.extui %9 : i1 to i32
    %c0_i32_9 = arith.constant 0 : i32
    %11 = arith.cmpi ne, %10, %c0_i32_9 : i32
    scf.if %11 {
      %c0_10 = arith.constant 0 : index
      %c0_11 = arith.constant 0 : index
      %12 = vector.load %arg6[%c0_10, %c0_11] : memref<16x256xf32, #tpu.memory_space<vmem>>, vector<16x256xf32>
      %c0_12 = arith.constant 0 : index
      %c0_13 = arith.constant 0 : index
      %13 = vector.load %arg5[%c0_12, %c0_13] : memref<1x256xf32, #tpu.memory_space<vmem>>, vector<1x256xf32>
      %14 = vector.broadcast %13 : vector<1x256xf32> to vector<16x256xf32>
      %15 = arith.addf %12, %14 : vector<16x256xf32>
      %c0_14 = arith.constant 0 : index
      %c0_15 = arith.constant 0 : index
      %16 = vector.load %arg6[%c0_14, %c0_15] : memref<16x256xf32, #tpu.memory_space<vmem>>, vector<16x256xf32>
      tpu.vector_store %arg6[%c0_14, %c0_15], %15 {strides = array<i32>} : memref<16x256xf32, #tpu.memory_space<vmem>>, vector<16x256xf32>,
    } else {
    }
    return
  }
  func.func @transform_0(%arg0: i32, %arg1: i32, %arg2: i32) -> (i32, i32) {
    %c0_i32 = arith.constant 0 : i32
    return %arg0, %arg2 : i32, i32
  }
  func.func @transform_1(%arg0: i32, %arg1: i32, %arg2: i32) -> (i32, i32) {
    %c0_i32 = arith.constant 0 : i32
    return %arg2, %arg1 : i32, i32
  }
  func.func @transform_2(%arg0: i32, %arg1: i32, %arg2: i32) -> (i32, i32) {
    %c0_i32 = arith.constant 0 : i32
    %c0_i32_0 = arith.constant 0 : i32
    return %c0_i32, %arg1 : i32, i32
  }
  func.func @transform_3(%arg0: i32, %arg1: i32, %arg2: i32) -> (i32, i32) {
    %c0_i32 = arith.constant 0 : i32
    return %arg0, %arg1 : i32, i32
  }
}

</mosaic_0001>

<bundles_post_ra>
// kernel: tpu_custom_call.1
= control target key start
LH: loop header
LB: loop body
LE: loop exit
PB: predicated region body
PF: predicated region fallthrough
CT: control target
= control target key end

     0   :  { %8 = vsyncpa [#allocation3], 0  ;;  %s450_s0 = inlined_call_operand.hbm [shape: bf16[16,128], index: 0, kind: input, shape index: {}]   ;;  %s451_s1 = inlined_call_operand.hbm [shape: bf16[128,256], index: 1, kind: input, shape index: {}]   ;;  %s452_s2 = inlined_call_operand.vmem [shape: f32[1,256], index: 2, kind: input, shape index: {}]   ;;  %s453_s3 = inlined_call_operand.hbm [shape: f32[16,256], index: 3, kind: output, shape index: {}]  }
   0x1   :  { %9 = vsyncpa [#allocation6], 0 }
   0x2   :  { %10 = vsyncpa [#allocation4], 0  ;;  %s381_s12 = smov [#allocation2]   ;;  %s309_s16 = scalar_lea.hbm %s450_s0, 128 }
   0x3   :  { %s16_s13 = sshll.u32 %s381_s12, 4  ;;  %p310_p0 = scmp.ne.s32.totalorder %s450_s0, %s309_s16  ;;  %s17_s13 = int_to_ptr.vmem [resolvable:$true] %s16_s13 }
   0x4   :  { %p313_p1 = scmp.lt.u32.totalorder %s309_s16, %s450_s0 }
   0x6   :  { %p315_p2 = pnand %p313_p1, %p310_p0 }
   0x8   :  { %318 = shalt.err (!%p315_p2)
}
   0x9   :  { %s319_s21 = scalar_lea.vmem %s17_s13, 128  ;;  %p324_p4 = scmp.lt.s32.totalorder %s17_s13, %s17_s13 }
   0xa   :  { %p320_p3 = scmp.ne.s32.totalorder %s17_s13, %s319_s21  ;;  %p325_p5 = scmp.lt.s32.totalorder %s319_s21, %s319_s21 }
   0xc   :  { %p326_p6 = por %p325_p5, %p324_p4 }
   0xe   :  { %p327_p7 = pnand %p326_p6, %p320_p3 }
  0x10   :  { %330 = shalt.err (!%p327_p7)
}
  0x11   :  { %s382_s22 = smov 64   ;;  %s383_s23 = smov 4  }
  0x12   :  { %22 = dma.hbm_to_vmem [thread:$0]  %s450_s0, 128, %s17_s13, [#allocation3], %s382_s22, %s382_s22, %s383_s23  }
  0x13   :  { %s384_s26 = smov [#allocation5]   ;;  %s331_s30 = scalar_lea.hbm %s451_s1, 2048 }
  0x14   :  { %s28_s27 = sshll.u32 %s384_s26, 4  ;;  %p332_p8 = scmp.ne.s32.totalorder %s451_s1, %s331_s30  ;;  %s29_s27 = int_to_ptr.vmem [resolvable:$true] %s28_s27 }
  0x15   :  { %p335_p9 = scmp.lt.u32.totalorder %s331_s30, %s451_s1 }
  0x17   :  { %p337_p10 = pnand %p335_p9, %p332_p8 }
  0x19   :  { %340 = shalt.err (!%p337_p10)
}
  0x1a   :  { %s341_s8 = scalar_lea.vmem %s29_s27, 2048  ;;  %p346_p12 = scmp.lt.s32.totalorder %s29_s27, %s29_s27 }
  0x1b   :  { %p342_p11 = scmp.ne.s32.totalorder %s29_s27, %s341_s8  ;;  %p347_p13 = scmp.lt.s32.totalorder %s341_s8, %s341_s8 }
  0x1d   :  { %p348_p0 = por %p347_p13, %p346_p12 }
  0x1f   :  { %p349_p1 = pnand %p348_p0, %p342_p11 }
  0x21   :  { %352 = shalt.err (!%p349_p1)
}
  0x22   :  { %s385_s0 = smov 128   ;;  %s386_s9 = smov 8  }
  0x23   :  { %34 = dma.hbm_to_vmem [thread:$0]  %s451_s1, 2048, %s29_s27, [#allocation6], %s385_s0, %s385_s0, %s386_s9  }
  0x24   :  { %375 = dma.done.wait [#allocation3], 128  }
  0x25   :  { %376 = vsyncadd [#allocation3], 4294967168 }
  0x26   :  { %377 = dma.done.wait [#allocation6], 2048  }
  0x27   :  { %378 = vsyncadd [#allocation6], 4294965248  ;;  %v387_v0 = vmov 0   ;;  %v284_v1 = vld [vmem:[#allocation5 + $0x4] ss:$8 sps:$4 sm:$0xff]   ;;  %v308_v17 = vld [vmem:[#allocation2] sm:$0xff]   ;;  %v220_v18 = vlaneseq }
  0x28   :  { %192 = vmatprep.mubr.bf16.mxu0 %v387_v0  ;;  %v286_v2 = vld [vmem:[#allocation5] ss:$8 sps:$4 sm:$0xff]   ;;  %160 = vmatprep.subr.bf16.mxu0 %v284_v1  ;;  %v287_v3 = vld [vmem:[#allocation5 + $0x14] ss:$8 sps:$4 sm:$0xff]   ;;  %v289_v4 = vld [vmem:[#allocation5 + $0x10] ss:$8 sps:$4 sm:$0xff]  }
  0x29   :  { %161 = vmatpush1.bf16.msra.mxu0 %v286_v2  ;;  %v290_v5 = vld [vmem:[#allocation5 + $0x24] ss:$8 sps:$4 sm:$0xff]   ;;  %v292_v6 = vld [vmem:[#allocation5 + $0x20] ss:$8 sps:$4 sm:$0xff]   ;;  %v293_v7 = vld [vmem:[#allocation5 + $0x34] ss:$8 sps:$4 sm:$0xff]  }
  0x2a   :  { %162 = vmatprep.subr.bf16.mxu0 %v287_v3  ;;  %v295_v8 = vld [vmem:[#allocation5 + $0x30] ss:$8 sps:$4 sm:$0xff]   ;;  %v296_v9 = vld [vmem:[#allocation5 + $0x44] ss:$8 sps:$4 sm:$0xff]   ;;  %v298_v10 = vld [vmem:[#allocation5 + $0x40] ss:$8 sps:$4 sm:$0xff]  }
  0x2b   :  { %v299_v11 = vld [vmem:[#allocation5 + $0x54] ss:$8 sps:$4 sm:$0xff]   ;;  %v301_v12 = vld [vmem:[#allocation5 + $0x50] ss:$8 sps:$4 sm:$0xff]   ;;  %v302_v13 = vld [vmem:[#allocation5 + $0x64] ss:$8 sps:$4 sm:$0xff]  }
  0x2c   :  { %v304_v14 = vld [vmem:[#allocation5 + $0x60] ss:$8 sps:$4 sm:$0xff]   ;;  %v305_v15 = vld [vmem:[#allocation5 + $0x74] ss:$8 sps:$4 sm:$0xff]   ;;  %v307_v16 = vld [vmem:[#allocation5 + $0x70] ss:$8 sps:$4 sm:$0xff]  }
  0x2d   :  { %163 = vmatpush1.bf16.msra.mxu0 %v289_v4  ;;  %v221_v19 = vshrl.u32 %v220_v18, 7  ;;  %v218_v21 = vld [vmem:[%s452_s2] sm:$0x3]  ;;  %s388_s13 = smov [#allocation7]  }
  0x2e   :  { %164 = vmatprep.subr.bf16.mxu0 %v290_v5  ;;  %s243_s14 = sshll.u32 %s388_s13, 4  ;;  %s244_s14 = int_to_ptr.vmem [resolvable:$true] %s243_s14 }
  0x2f   :  { %v222_v20 = vsub.s32 0, %v221_v19  ;;  %v226_v22 = vsub.s32 1, %v221_v19  ;;  %s353_s15 = scalar_lea.vmem %s244_s14, 512  ;;  %p358_p3 = scmp.lt.s32.totalorder %s244_s14, %s244_s14 }
  0x30   :  { %p354_p2 = scmp.ne.s32.totalorder %s244_s14, %s353_s15  ;;  %p359_p4 = scmp.lt.s32.totalorder %s353_s15, %s353_s15 }
  0x31   :  { %165 = vmatpush1.bf16.msra.mxu0 %v292_v6  ;;  %v223_v23 = vrot.slane %v218_v21, %v222_v20  ;;  %v227_v25 = vrot.slane %v218_v21, %v226_v22 }
  0x32   :  { %166 = vmatprep.subr.bf16.mxu0 %v293_v7  ;;  %p360_p5 = por %p359_p4, %p358_p3 }
  0x34   :  { %p361_p6 = pnand %p360_p5, %p354_p2 }
  0x35   :  { %167 = vmatpush1.bf16.msra.mxu0 %v295_v8 }
  0x36   :  { %168 = vmatprep.subr.bf16.mxu0 %v296_v9 }
  0x39   :  { %169 = vmatpush1.bf16.msra.mxu0 %v298_v10 }
  0x3a   :  { %170 = vmatprep.subr.bf16.mxu0 %v299_v11 }
  0x3d   :  { %171 = vmatpush1.bf16.msra.mxu0 %v301_v12 }
  0x3e   :  { %172 = vmatprep.subr.bf16.mxu0 %v302_v13 }
  0x41   :  { %173 = vmatpush1.bf16.msra.mxu0 %v304_v14 }
  0x42   :  { %174 = vmatprep.subr.bf16.mxu0 %v305_v15 }
  0x45   :  { %175 = vmatpush1.bf16.msra.mxu0 %v307_v16 }
  0x48   :  { %193 = vmatmul.mubr.bf16.vlgmr.msra.gmra.mrb[0].mxu0 %v308_v17 }
 0x11b   :  { %v194_v24 = vpop.f32.mrb[0].mxu0 }
 0x11c   :  { %v196_v26 = vpop.f32.mrb[1].mxu0  ;;  %v230_v28 = vadd.f32 %v223_v23, %v194_v24 }
 0x11d   :  { %v198_v27 = vpop.f32.mrb[2].mxu0  ;;  %v231_v30 = vadd.f32 %v227_v25, %v196_v26 }
 0x11e   :  { %v200_v29 = vpop.f32.mrb[3].mxu0  ;;  %234 = vst [vmem:[#allocation7] sm:$0xff] %v230_v28  ;;  %v232_v31 = vadd.f32 %v223_v23, %v198_v27 }
 0x11f   :  { %235 = vst [vmem:[#allocation7 + $0x8] sm:$0xff] %v231_v30  ;;  %v233_v32 = vadd.f32 %v227_v25, %v200_v29 }
 0x120   :  { %236 = vst [vmem:[#allocation7 + $0x10] sm:$0xff] %v232_v31 }
 0x121   :  { %237 = vst [vmem:[#allocation7 + $0x18] sm:$0xff] %v233_v32 }
 0x122   :  { %364 = shalt.err (!%p361_p6)
}
 0x123   :  { %s365_s17 = scalar_lea.hbm %s453_s3, 512 }
 0x124   :  { %p366_p7 = scmp.ne.s32.totalorder %s453_s3, %s365_s17  ;;  %p369_p8 = scmp.lt.u32.totalorder %s365_s17, %s453_s3 }
 0x126   :  { %p371_p9 = pnand %p369_p8, %p366_p7 }
 0x128   :  { %374 = shalt.err (!%p371_p9)
}
 0x129   :  { %s389_s22 = smov 256   ;;  %s390_s23 = smov 16  }
 0x12a   :  { %249 = dma.vmem_to_hbm [thread:$0]  %s244_s14, 512, %s453_s3, [#allocation4], %s389_s22, %s389_s22, %s390_s23  }
 0x12b   :  { %379 = dma.done.wait [#allocation4], 512  }
 0x12c   :  { %380 = vsyncadd [#allocation4], 4294966784 }
 0x12d   :  { %253 = vsyncpa [#allocation3], 1 }
 0x12e   :  { %254 = vsyncpa [#allocation6], 1 }
 0x12f   :  { %255 = vsyncpa [#allocation4], 1 }

</bundles_post_ra>
